<compile_context>
chip_gen: v7x
topology: tpu7x:2x2x1
jax: 0.10.0
libtpu: 0.0.40
codegen_flags: <defaults>
</compile_context>

<pallas_src>
import functools

import jax
import jax.numpy as jnp
from jax.experimental import pallas as pl
from jax.experimental.pallas import tpu as pltpu


# ----------------------------------------------------------------------------
# Kernel
# ----------------------------------------------------------------------------
def _gridbp_kernel(in_ref, out_ref, *, Lij, n, num_sweeps):
    n_pad = in_ref.shape[1]

    # Per-row loads (no whole-slab load + sublane slicing).
    mu = in_ref[0:1, :]
    var = in_ref[1:2, :]
    Li = in_ref[2:3, :]
    hi = in_ref[3:4, :]
    hf = in_ref[4:5, :]
    Lf = in_ref[5:6, :]
    hb = in_ref[6:7, :]
    Lb = in_ref[7:8, :]

    idx = jax.lax.broadcasted_iota(jnp.int32, (1, n_pad), 1)
    msg_mask = idx <= n - 2          # lanes 0..n-2 hold the (n-1) edge messages
    not_first = idx >= 1

    # shift_left reads the lane just past the message range -> force it to 0
    # once on load (robust to callers supplying junk in the trailing pad lane).
    hb = jnp.where(msg_mask, hb, 0.0)
    Lb = jnp.where(msg_mask, Lb, 0.0)

    neg_Lij = -Lij                   # compile-time scalars
    neg_Lij2 = -(Lij * Lij)

    def shift_right(v):              # y[i] = v[i-1], y[0] = 0
        return jnp.where(not_first, pltpu.roll(v, shift=1, axis=1), 0.0)

    def shift_left(v):               # y[i] = v[i+1] for i <= n-2, else 0
        return jnp.where(msg_mask, pltpu.roll(v, shift=n_pad - 1, axis=1), 0.0)

    def fast_recip(x):               # EUP approx reciprocal + one Newton step
        r = pl.reciprocal(x, approx=True)
        return r * (2.0 - x * r)

    # Sweep-invariant quantities (hoisted out of the sweep loop).
    Lin = 1.0 / var
    hin = Lin * mu
    Lpass = Lin + Li
    hpass = hin + hi

    def sweep(carry):
        hf, Lf, hb, Lb = carry
        # ---- forward messages -------------------------------------------------
        A_f = Lpass + shift_right(Lf)
        B_f = hpass + shift_right(hf)
        inv_Af = fast_recip(jnp.where(msg_mask, A_f, 1.0))   # finite guard
        hf_new = jnp.where(msg_mask, (neg_Lij * inv_Af) * B_f, 0.0)
        Lf_new = jnp.where(msg_mask, neg_Lij2 * inv_Af, 0.0)
        # ---- backward messages (shift applied to the sums) ---------------------
        A_b = shift_left(Lpass + Lb)
        B_b = shift_left(hpass + hb)
        inv_Ab = fast_recip(jnp.where(msg_mask, A_b, 1.0))
        hb_new = jnp.where(msg_mask, (neg_Lij * inv_Ab) * B_b, 0.0)
        Lb_new = jnp.where(msg_mask, neg_Lij2 * inv_Ab, 0.0)
        return hf_new, Lf_new, hb_new, Lb_new

    msgs = (hf, Lf, hb, Lb)
    if num_sweeps == 1:
        msgs = sweep(msgs)
    else:
        msgs = jax.lax.fori_loop(0, num_sweeps, lambda _, c: sweep(c), msgs,
                                 unroll=(num_sweeps <= 8))
    hf, Lf, hb, Lb = msgs

    # ---- marginals from the final messages -----------------------------------
    Li_hat = Li + shift_right(Lf) + Lb
    hi_hat = hi + shift_right(hf) + hb
    var_out = 1.0 / Li_hat           # exact divide, once per call
    mean_out = var_out * hi_hat

    # Per-row stores; output layout == input layout (complete next-call state).
    out_ref[0:1, :] = mean_out
    out_ref[1:2, :] = var_out
    out_ref[2:3, :] = Li
    out_ref[3:4, :] = hi
    out_ref[4:5, :] = hf
    out_ref[5:6, :] = Lf
    out_ref[6:7, :] = hb
    out_ref[7:8, :] = Lb


# ----------------------------------------------------------------------------
# Packed-state wrappers
# ----------------------------------------------------------------------------
def _round_up(x, m):
    return ((x + m - 1) // m) * m


def pack_gridbp_state(mu_in, var_in, *, a=0.7, s=0.51, s0=1.0):
    """Pack observations + fresh BP state into one (8, n_pad) f32 slab.

    Done ONCE per problem; subsequent steps carry the packed slab directly.
    Pad lanes: var/Li padded with 1.0 (keeps 1/x finite), everything else 0.
    """
    n = mu_in.shape[0]
    n_pad = max(128, _round_up(n, 128))
    f32 = jnp.float32

    def row(vals, pad=0.0):
        r = jnp.full((1, n_pad), pad, f32)
        return r.at[0, :n].set(jnp.asarray(vals, f32).reshape(n))

    Li = (jnp.concatenate([jnp.full((1,), 1.0 / s0, f32),
                           jnp.full((n - 1,), 1.0 / s, f32)])
          + jnp.concatenate([jnp.full((n - 1,), a * a / s, f32),
                             jnp.zeros((1,), f32)]))
    msg_L = jnp.concatenate([jnp.ones((n - 1,), f32), jnp.zeros((1,), f32)])
    zeros_n = jnp.zeros((n,), f32)

    return jnp.concatenate([
        row(mu_in),            # 0: mu_in
        row(var_in, 1.0),      # 1: var_in
        row(Li, 1.0),          # 2: Li
        row(zeros_n),          # 3: hi
        row(zeros_n),          # 4: hf
        row(msg_L),            # 5: Lf
        row(zeros_n),          # 6: hb
        row(msg_L),            # 7: Lb
    ], axis=0)


def gridbp_step(packed, *, n, a=0.7, s=0.51, num_sweeps=1):
    """One (or `num_sweeps` fused) GridBP forward sweep(s) on a packed slab.

    Returns a new (8, n_pad) slab with the same layout: rows 0-1 are the
    marginal mean/var, rows 2-3 echo Li/hi, rows 4-7 the updated messages.
    The input slab is aliased to the output (treat it as donated).
    """
    assert num_sweeps >= 1
    n_pad = packed.shape[1]
    Lij = -a / s

    kwargs = {}
    # Whole-array (gridless) block; raise the scoped-VMEM limit only if the
    # slabs + temporaries outgrow the default (16 MiB v5e / 32 MiB v6e,v7x).
    vmem_est = 64 * n_pad * 4        # ~2 double-buffered slabs + temporaries
    if vmem_est > (16 << 20):
        kwargs["compiler_params"] = pltpu.CompilerParams(
            vmem_limit_bytes=min(2 * vmem_est, 64 << 20))

    return pl.pallas_call(
        functools.partial(_gridbp_kernel, Lij=Lij, n=n, num_sweeps=num_sweeps),
        out_shape=jax.ShapeDtypeStruct((8, n_pad), jnp.float32),
        input_output_aliases={0: 0},
        **kwargs,
    )(packed)


def set_observations(packed, mu_in, var_in):
    """Overwrite rows 0-1 of a packed slab with (fixed) observations."""
    n = mu_in.shape[0]
    f32 = jnp.float32
    obs = jnp.stack([jnp.asarray(mu_in, f32).reshape(n),
                     jnp.asarray(var_in, f32).reshape(n)], axis=0)
    return packed.at[0:2, :n].set(obs)


def unpack_marginals(packed, n):
    return packed[0, :n].reshape(n, 1), packed[1, :n].reshape(n, 1)


def unpack_state(packed, n):
    return dict(Li=packed[2, :n], hi=packed[3, :n],
                hf=packed[4, :n], Lf=packed[5, :n],
                hb=packed[6, :n], Lb=packed[7, :n])


# ----------------------------------------------------------------------------
# Pure-JAX reference (transcription of the PyTorch forward, float32)
# ----------------------------------------------------------------------------
def make_gridbp_state(n, a=0.7, s=0.51, s0=1.0, dtype=jnp.float32):
    """Deterministic init mirroring GridBP.__init__ (messages padded to len n)."""
    Li = (jnp.concatenate([jnp.full((1,), 1.0 / s0, dtype),
                           jnp.full((n - 1,), 1.0 / s, dtype)])
          + jnp.concatenate([jnp.full((n - 1,), a * a / s, dtype),
                             jnp.zeros((1,), dtype)]))
    hi = jnp.zeros((n,), dtype)
    pad = jnp.zeros((1,), dtype)
    hf = jnp.zeros((n,), dtype)
    Lf = jnp.concatenate([jnp.ones((n - 1,), dtype), pad])
    hb = jnp.zeros((n,), dtype)
    Lb = jnp.concatenate([jnp.ones((n - 1,), dtype), pad])
    return dict(Li=Li, hi=hi, hf=hf, Lf=Lf, hb=hb, Lb=Lb)


def gridbp_reference(mu_in, var_in, state, *, a=0.7, s=0.51):
    """Pure-JAX transcription of the PyTorch forward (float32), (n,1) layout."""
    n = mu_in.shape[0]
    Lij = -a / s
    col = lambda x: jnp.asarray(x, jnp.float32).reshape(-1, 1)
    mu_in, var_in = col(mu_in), col(var_in)
    Li, hi = col(state["Li"]), col(state["hi"])
    hf, Lf = col(state["hf"])[: n - 1], col(state["Lf"])[: n - 1]
    hb, Lb = col(state["hb"])[: n - 1], col(state["Lb"])[: n - 1]
    zero = jnp.zeros((1, 1), jnp.float32)

    Lin = 1.0 / var_in
    hin = Lin * mu_in
    Lpass = Lin + Li
    hpass = hin + hi

    den_f = Lpass[:-1] + jnp.concatenate([zero, Lf[:-1]], axis=0)
    hf_new = -Lij / den_f * (hpass[:-1] + jnp.concatenate([zero, hf[:-1]], axis=0))
    Lf_new = -Lij ** 2 / den_f
    den_b = Lpass[1:] + jnp.concatenate([Lb[1:], zero], axis=0)
    hb_new = -Lij / den_b * (hpass[1:] + jnp.concatenate([hb[1:], zero], axis=0))
    Lb_new = -Lij ** 2 / den_b

    Li_hat = Li + jnp.concatenate([zero, Lf_new], axis=0) + jnp.concatenate([Lb_new, zero], axis=0)
    hi_hat = hi + jnp.concatenate([zero, hf_new], axis=0) + jnp.concatenate([hb_new, zero], axis=0)
    var_out = 1.0 / Li_hat
    mean_out = var_out * hi_hat

    new_state = dict(
        Li=state["Li"], hi=state["hi"],
        hf=jnp.concatenate([hf_new, zero], axis=0).reshape(n),
        Lf=jnp.concatenate([Lf_new, zero], axis=0).reshape(n),
        hb=jnp.concatenate([hb_new, zero], axis=0).reshape(n),
        Lb=jnp.concatenate([Lb_new, zero], axis=0).reshape(n))
    return mean_out, var_out, new_state


# TODO(synk): source_to_quant (erfc-based quantizer) is a separate utility, not
# part of the forward pass; it is not implemented as a Pallas kernel here.


# ----------------------------------------------------------------------------
# Tests
# ----------------------------------------------------------------------------
if __name__ == "__main__":
    a, s, s0 = 0.7, 0.51, 1.0
    key = jax.random.PRNGKey(0)
    k_mu, k_var = jax.random.split(key)

    # ---- chain length that is already a lane multiple -------------------------
    n = 128
    mu_in = jax.random.normal(k_mu, (n, 1), dtype=jnp.float32)
    var_in = jax.random.uniform(k_var, (n, 1), dtype=jnp.float32,
                                minval=0.5, maxval=1.5)

    packed = pack_gridbp_state(mu_in, var_in, a=a, s=s, s0=s0)
    obs_rows = packed[0:2, :]            # save observations before aliased call

    # single sweep (== GridBP.forward)
    out1 = gridbp_step(packed, n=n, a=a, s=s, num_sweeps=1)
    jax.block_until_ready(out1)
    mean1, var1 = unpack_marginals(out1, n)
    st1 = unpack_state(out1, n)

    state0 = make_gridbp_state(n, a=a, s=s, s0=s0)
    mean_r, var_r, st_r = gridbp_reference(mu_in, var_in, state0, a=a, s=s)
    assert jnp.allclose(mean1, mean_r, rtol=1e-5, atol=1e-5)
    assert jnp.allclose(var1, var_r, rtol=1e-5, atol=1e-5)
    for k_ in ("hf", "Lf", "hb", "Lb"):
        assert jnp.allclose(st1[k_], st_r[k_], rtol=1e-5, atol=1e-5)

    # packed-state carry: the output slab is a complete next-call input; only
    # rows 0-1 are restored (GridBP.forward keeps the observations fixed).
    packed_next = out1.at[0:2, :].set(obs_rows)
    out2 = gridbp_step(packed_next, n=n, a=a, s=s, num_sweeps=1)
    jax.block_until_ready(out2)
    mean2, var2 = unpack_marginals(out2, n)
    mean2_r, var2_r, _ = gridbp_reference(mu_in, var_in, st_r, a=a, s=s)
    assert jnp.allclose(mean2, mean2_r, rtol=1e-5, atol=1e-5)
    assert jnp.allclose(var2, var2_r, rtol=1e-5, atol=1e-5)

    # fused multi-sweep (== GridBP.bp(num_iter=4)) in a single kernel launch
    num_sweeps = 4
    packed4 = pack_gridbp_state(mu_in, var_in, a=a, s=s, s0=s0)
    out4 = gridbp_step(packed4, n=n, a=a, s=s, num_sweeps=num_sweeps)
    jax.block_until_ready(out4)
    mean4, var4 = unpack_marginals(out4, n)
    st = make_gridbp_state(n, a=a, s=s, s0=s0)
    for _ in range(num_sweeps):
        mean4_r, var4_r, st = gridbp_reference(mu_in, var_in, st, a=a, s=s)
    assert jnp.allclose(mean4, mean4_r, rtol=1e-4, atol=1e-4)
    assert jnp.allclose(var4, var4_r, rtol=1e-4, atol=1e-4)

    # ---- chain length that exercises the lane-padding path --------------------
    n2 = 96
    mu_p = jax.random.normal(k_mu, (n2, 1), dtype=jnp.float32)
    var_p = jax.random.uniform(k_var, (n2, 1), dtype=jnp.float32,
                               minval=0.5, maxval=1.5)
    packed_p = pack_gridbp_state(mu_p, var_p, a=a, s=s, s0=s0)
    out_p = gridbp_step(packed_p, n=n2, a=a, s=s, num_sweeps=1)
    jax.block_until_ready(out_p)
    m_p, v_p = unpack_marginals(out_p, n2)
    state_p = make_gridbp_state(n2, a=a, s=s, s0=s0)
    m_pr, v_pr, _ = gridbp_reference(mu_p, var_p, state_p, a=a, s=s)
    assert jnp.allclose(m_p, m_pr, rtol=1e-5, atol=1e-5)
    assert jnp.allclose(v_p, v_pr, rtol=1e-5, atol=1e-5)

    print("KERNEL_OK")
</pallas_src>

<mosaic_0001>
module attributes {stable_mosaic.version = 11 : i64} {
  func.func @_gridbp_kernel(%arg0: memref<8x128xf32, #tpu.memory_space<vmem>>, %arg1: memref<8x128xf32, #tpu.memory_space<vmem>>) attributes {dimension_semantics = [], scalar_prefetch = 0 : i64, scratch_operands = 0 : i64, tpu.core_type = #tpu.core_type<tc>} {
    %c0 = arith.constant 0 : index
    %c0_0 = arith.constant 0 : index
    %0 = vector.load %arg0[%c0, %c0_0] : memref<8x128xf32, #tpu.memory_space<vmem>>, vector<1x128xf32>
    %c1 = arith.constant 1 : index
    %c0_1 = arith.constant 0 : index
    %1 = vector.load %arg0[%c1, %c0_1] : memref<8x128xf32, #tpu.memory_space<vmem>>, vector<1x128xf32>
    %c2 = arith.constant 2 : index
    %c0_2 = arith.constant 0 : index
    %2 = vector.load %arg0[%c2, %c0_2] : memref<8x128xf32, #tpu.memory_space<vmem>>, vector<1x128xf32>
    %c3 = arith.constant 3 : index
    %c0_3 = arith.constant 0 : index
    %3 = vector.load %arg0[%c3, %c0_3] : memref<8x128xf32, #tpu.memory_space<vmem>>, vector<1x128xf32>
    %c4 = arith.constant 4 : index
    %c0_4 = arith.constant 0 : index
    %4 = vector.load %arg0[%c4, %c0_4] : memref<8x128xf32, #tpu.memory_space<vmem>>, vector<1x128xf32>
    %c5 = arith.constant 5 : index
    %c0_5 = arith.constant 0 : index
    %5 = vector.load %arg0[%c5, %c0_5] : memref<8x128xf32, #tpu.memory_space<vmem>>, vector<1x128xf32>
    %c6 = arith.constant 6 : index
    %c0_6 = arith.constant 0 : index
    %6 = vector.load %arg0[%c6, %c0_6] : memref<8x128xf32, #tpu.memory_space<vmem>>, vector<1x128xf32>
    %c7 = arith.constant 7 : index
    %c0_7 = arith.constant 0 : index
    %7 = vector.load %arg0[%c7, %c0_7] : memref<8x128xf32, #tpu.memory_space<vmem>>, vector<1x128xf32>
    %8 = tpu.iota {dimensions = array<i32: 1>} : vector<1x128xi32>
    %c126_i32 = arith.constant 126 : i32
    %9 = vector.broadcast %c126_i32 : i32 to vector<1x128xi32>
    %10 = arith.cmpi sle, %8, %9 : vector<1x128xi32>
    %c1_i32 = arith.constant 1 : i32
    %11 = vector.broadcast %c1_i32 : i32 to vector<1x128xi32>
    %12 = arith.cmpi sge, %8, %11 : vector<1x128xi32>
    %cst = arith.constant 0.000000e+00 : f32
    %13 = vector.broadcast %cst : f32 to vector<1x128xf32>
    %14 = arith.select %10, %6, %13 : vector<1x128xi1>, vector<1x128xf32>
    %cst_8 = arith.constant 0.000000e+00 : f32
    %15 = vector.broadcast %cst_8 : f32 to vector<1x128xf32>
    %16 = arith.select %10, %7, %15 : vector<1x128xi1>, vector<1x128xf32>
    %cst_9 = arith.constant 1.000000e+00 : f32
    %17 = vector.broadcast %cst_9 : f32 to vector<1x128xf32>
    %18 = arith.divf %17, %1 : vector<1x128xf32>
    %19 = arith.mulf %18, %0 : vector<1x128xf32>
    %20 = arith.addf %18, %2 : vector<1x128xf32>
    %21 = arith.addf %19, %3 : vector<1x128xf32>
    %c1_i32_10 = arith.constant 1 : i32
    %22 = tpu.dynamic_rotate %5 by %c1_i32_10 dim 1 : vector<1x128xf32>, i32 -> vector<1x128xf32>
    %cst_11 = arith.constant 0.000000e+00 : f32
    %23 = vector.broadcast %cst_11 : f32 to vector<1x128xf32>
    %24 = arith.select %12, %22, %23 : vector<1x128xi1>, vector<1x128xf32>
    %25 = arith.addf %20, %24 : vector<1x128xf32>
    %c1_i32_12 = arith.constant 1 : i32
    %26 = tpu.dynamic_rotate %4 by %c1_i32_12 dim 1 : vector<1x128xf32>, i32 -> vector<1x128xf32>
    %cst_13 = arith.constant 0.000000e+00 : f32
    %27 = vector.broadcast %cst_13 : f32 to vector<1x128xf32>
    %28 = arith.select %12, %26, %27 : vector<1x128xi1>, vector<1x128xf32>
    %29 = arith.addf %21, %28 : vector<1x128xf32>
    %cst_14 = arith.constant 1.000000e+00 : f32
    %30 = vector.broadcast %cst_14 : f32 to vector<1x128xf32>
    %31 = arith.select %10, %25, %30 : vector<1x128xi1>, vector<1x128xf32>
    %32 = tpu.reciprocal %31 {approx = true} : vector<1x128xf32> -> vector<1x128xf32>
    %33 = arith.mulf %31, %32 : vector<1x128xf32>
    %cst_15 = arith.constant 2.000000e+00 : f32
    %34 = vector.broadcast %cst_15 : f32 to vector<1x128xf32>
    %35 = arith.subf %34, %33 : vector<1x128xf32>
    %36 = arith.mulf %32, %35 : vector<1x128xf32>
    %cst_16 = arith.constant 1.37254906 : f32
    %37 = vector.broadcast %cst_16 : f32 to vector<1x128xf32>
    %38 = arith.mulf %37, %36 : vector<1x128xf32>
    %39 = arith.mulf %38, %29 : vector<1x128xf32>
    %cst_17 = arith.constant 0.000000e+00 : f32
    %40 = vector.broadcast %cst_17 : f32 to vector<1x128xf32>
    %41 = arith.select %10, %39, %40 : vector<1x128xi1>, vector<1x128xf32>
    %cst_18 = arith.constant -1.88389087 : f32
    %42 = vector.broadcast %cst_18 : f32 to vector<1x128xf32>
    %43 = arith.mulf %42, %36 : vector<1x128xf32>
    %cst_19 = arith.constant 0.000000e+00 : f32
    %44 = vector.broadcast %cst_19 : f32 to vector<1x128xf32>
    %45 = arith.select %10, %43, %44 : vector<1x128xi1>, vector<1x128xf32>
    %46 = arith.addf %20, %16 : vector<1x128xf32>
    %c127_i32 = arith.constant 127 : i32
    %47 = tpu.dynamic_rotate %46 by %c127_i32 dim 1 : vector<1x128xf32>, i32 -> vector<1x128xf32>
    %cst_20 = arith.constant 0.000000e+00 : f32
    %48 = vector.broadcast %cst_20 : f32 to vector<1x128xf32>
    %49 = arith.select %10, %47, %48 : vector<1x128xi1>, vector<1x128xf32>
    %50 = arith.addf %21, %14 : vector<1x128xf32>
    %c127_i32_21 = arith.constant 127 : i32
    %51 = tpu.dynamic_rotate %50 by %c127_i32_21 dim 1 : vector<1x128xf32>, i32 -> vector<1x128xf32>
    %cst_22 = arith.constant 0.000000e+00 : f32
    %52 = vector.broadcast %cst_22 : f32 to vector<1x128xf32>
    %53 = arith.select %10, %51, %52 : vector<1x128xi1>, vector<1x128xf32>
    %cst_23 = arith.constant 1.000000e+00 : f32
    %54 = vector.broadcast %cst_23 : f32 to vector<1x128xf32>
    %55 = arith.select %10, %49, %54 : vector<1x128xi1>, vector<1x128xf32>
    %56 = tpu.reciprocal %55 {approx = true} : vector<1x128xf32> -> vector<1x128xf32>
    %57 = arith.mulf %55, %56 : vector<1x128xf32>
    %cst_24 = arith.constant 2.000000e+00 : f32
    %58 = vector.broadcast %cst_24 : f32 to vector<1x128xf32>
    %59 = arith.subf %58, %57 : vector<1x128xf32>
    %60 = arith.mulf %56, %59 : vector<1x128xf32>
    %cst_25 = arith.constant 1.37254906 : f32
    %61 = vector.broadcast %cst_25 : f32 to vector<1x128xf32>
    %62 = arith.mulf %61, %60 : vector<1x128xf32>
    %63 = arith.mulf %62, %53 : vector<1x128xf32>
    %cst_26 = arith.constant 0.000000e+00 : f32
    %64 = vector.broadcast %cst_26 : f32 to vector<1x128xf32>
    %65 = arith.select %10, %63, %64 : vector<1x128xi1>, vector<1x128xf32>
    %cst_27 = arith.constant -1.88389087 : f32
    %66 = vector.broadcast %cst_27 : f32 to vector<1x128xf32>
    %67 = arith.mulf %66, %60 : vector<1x128xf32>
    %cst_28 = arith.constant 0.000000e+00 : f32
    %68 = vector.broadcast %cst_28 : f32 to vector<1x128xf32>
    %69 = arith.select %10, %67, %68 : vector<1x128xi1>, vector<1x128xf32>
    %c1_i32_29 = arith.constant 1 : i32
    %70 = tpu.dynamic_rotate %45 by %c1_i32_29 dim 1 : vector<1x128xf32>, i32 -> vector<1x128xf32>
    %cst_30 = arith.constant 0.000000e+00 : f32
    %71 = vector.broadcast %cst_30 : f32 to vector<1x128xf32>
    %72 = arith.select %12, %70, %71 : vector<1x128xi1>, vector<1x128xf32>
    %73 = arith.addf %2, %72 : vector<1x128xf32>
    %74 = arith.addf %73, %69 : vector<1x128xf32>
    %c1_i32_31 = arith.constant 1 : i32
    %75 = tpu.dynamic_rotate %41 by %c1_i32_31 dim 1 : vector<1x128xf32>, i32 -> vector<1x128xf32>
    %cst_32 = arith.constant 0.000000e+00 : f32
    %76 = vector.broadcast %cst_32 : f32 to vector<1x128xf32>
    %77 = arith.select %12, %75, %76 : vector<1x128xi1>, vector<1x128xf32>
    %78 = arith.addf %3, %77 : vector<1x128xf32>
    %79 = arith.addf %78, %65 : vector<1x128xf32>
    %cst_33 = arith.constant 1.000000e+00 : f32
    %80 = vector.broadcast %cst_33 : f32 to vector<1x128xf32>
    %81 = arith.divf %80, %74 : vector<1x128xf32>
    %82 = arith.mulf %81, %79 : vector<1x128xf32>
    %c0_34 = arith.constant 0 : index
    %c0_35 = arith.constant 0 : index
    %83 = vector.load %arg1[%c0_34, %c0_35] : memref<8x128xf32, #tpu.memory_space<vmem>>, vector<1x128xf32>
    tpu.vector_store %arg1[%c0_34, %c0_35], %82 {strides = array<i32>} : memref<8x128xf32, #tpu.memory_space<vmem>>, vector<1x128xf32>,
    %c1_36 = arith.constant 1 : index
    %c0_37 = arith.constant 0 : index
    %84 = vector.load %arg1[%c1_36, %c0_37] : memref<8x128xf32, #tpu.memory_space<vmem>>, vector<1x128xf32>
    tpu.vector_store %arg1[%c1_36, %c0_37], %81 {strides = array<i32>} : memref<8x128xf32, #tpu.memory_space<vmem>>, vector<1x128xf32>,
    %c2_38 = arith.constant 2 : index
    %c0_39 = arith.constant 0 : index
    %85 = vector.load %arg1[%c2_38, %c0_39] : memref<8x128xf32, #tpu.memory_space<vmem>>, vector<1x128xf32>
    tpu.vector_store %arg1[%c2_38, %c0_39], %2 {strides = array<i32>} : memref<8x128xf32, #tpu.memory_space<vmem>>, vector<1x128xf32>,
    %c3_40 = arith.constant 3 : index
    %c0_41 = arith.constant 0 : index
    %86 = vector.load %arg1[%c3_40, %c0_41] : memref<8x128xf32, #tpu.memory_space<vmem>>, vector<1x128xf32>
    tpu.vector_store %arg1[%c3_40, %c0_41], %3 {strides = array<i32>} : memref<8x128xf32, #tpu.memory_space<vmem>>, vector<1x128xf32>,
    %c4_42 = arith.constant 4 : index
    %c0_43 = arith.constant 0 : index
    %87 = vector.load %arg1[%c4_42, %c0_43] : memref<8x128xf32, #tpu.memory_space<vmem>>, vector<1x128xf32>
    tpu.vector_store %arg1[%c4_42, %c0_43], %41 {strides = array<i32>} : memref<8x128xf32, #tpu.memory_space<vmem>>, vector<1x128xf32>,
    %c5_44 = arith.constant 5 : index
    %c0_45 = arith.constant 0 : index
    %88 = vector.load %arg1[%c5_44, %c0_45] : memref<8x128xf32, #tpu.memory_space<vmem>>, vector<1x128xf32>
    tpu.vector_store %arg1[%c5_44, %c0_45], %45 {strides = array<i32>} : memref<8x128xf32, #tpu.memory_space<vmem>>, vector<1x128xf32>,
    %c6_46 = arith.constant 6 : index
    %c0_47 = arith.constant 0 : index
    %89 = vector.load %arg1[%c6_46, %c0_47] : memref<8x128xf32, #tpu.memory_space<vmem>>, vector<1x128xf32>
    tpu.vector_store %arg1[%c6_46, %c0_47], %65 {strides = array<i32>} : memref<8x128xf32, #tpu.memory_space<vmem>>, vector<1x128xf32>,
    %c7_48 = arith.constant 7 : index
    %c0_49 = arith.constant 0 : index
    %90 = vector.load %arg1[%c7_48, %c0_49] : memref<8x128xf32, #tpu.memory_space<vmem>>, vector<1x128xf32>
    tpu.vector_store %arg1[%c7_48, %c0_49], %69 {strides = array<i32>} : memref<8x128xf32, #tpu.memory_space<vmem>>, vector<1x128xf32>,
    return
  }
}

</mosaic_0001>

<bundles_post_ra>
// kernel: tpu_custom_call.1
= control target key start
LH: loop header
LB: loop body
LE: loop exit
PB: predicated region body
PF: predicated region fallthrough
CT: control target
= control target key end

     0   :  { %6 = vsyncpa [#allocation3], 0  ;;  %s236_s0 = inlined_call_operand.hbm [shape: f32[8,128], index: 0, kind: input, shape index: {}, may-alias: {0,1}]   ;;  %s237_s1 = inlined_call_operand.hbm [shape: f32[8,128], index: 1, kind: output, shape index: {}, may-alias: {0,1}]  }
   0x1   :  { %7 = vsyncpa [#allocation4], 0  ;;  %s171_s6 = smov [#allocation2]   ;;  %s123_s10 = scalar_lea.hbm %s236_s0, 128 }
   0x2   :  { %s14_s7 = sshll.u32 %s171_s6, 4  ;;  %p124_p0 = scmp.ne.s32.totalorder %s236_s0, %s123_s10  ;;  %s15_s7 = int_to_ptr.vmem [resolvable:$true] %s14_s7 }
   0x3   :  { %p127_p1 = scmp.lt.u32.totalorder %s123_s10, %s236_s0 }
   0x5   :  { %p129_p2 = pnand %p127_p1, %p124_p0 }
   0x7   :  { %132 = shalt.err (!%p129_p2)
}
   0x8   :  { %s133_s15 = scalar_lea.vmem %s15_s7, 128  ;;  %p138_p4 = scmp.lt.s32.totalorder %s15_s7, %s15_s7 }
   0x9   :  { %p134_p3 = scmp.ne.s32.totalorder %s15_s7, %s133_s15  ;;  %p139_p5 = scmp.lt.s32.totalorder %s133_s15, %s133_s15 }
   0xb   :  { %p140_p6 = por %p139_p5, %p138_p4 }
   0xd   :  { %p141_p7 = pnand %p140_p6, %p134_p3 }
   0xf   :  { %144 = shalt.err (!%p141_p7)
}
  0x10   :  { %17 = dma.hbm_to_vmem [thread:$0]  %s236_s0, 128, %s15_s7, [#allocation3]  }
  0x11   :  { %167 = dma.done.wait [#allocation3], 128  }
  0x12   :  { %168 = vsyncadd [#allocation3], 4294967168  ;;  %v26_v0 = vld [vmem:[#allocation2 + $0x5] sm:$0x1]  ;;  %v22_v1 = vld [vmem:[#allocation2 + $0x1] sm:$0x1]  ;;  %v29_v2 = vlaneseq }
  0x13   :  { %s172_s18 = smov 1   ;;  %v198_v3 = vld [vmem:[#allocation2 + $0x2] sm:$0x1]  ;;  %115 = vrcp.f32 %v22_v1  ;;  %v25_v4 = vld [vmem:[#allocation2 + $0x4] sm:$0x1]  ;;  %s173_s0 = smov 127  }
  0x14   :  { %40 = vrot.lane.b32.xlu0 %v26_v0, %s172_s18  ;;  %90 = vst [vmem:[#allocation5 + $0x2] sm:$0x1] %v198_v3  ;;  %v201_v5 = vld [vmem:[#allocation2 + $0x3] sm:$0x1]  ;;  %v30_v6 = vand.u32 127, %v29_v2  ;;  %s174_s19 = smov [#allocation5]  }
  0x15   :  { %91 = vst [vmem:[#allocation5 + $0x3] sm:$0x1] %v201_v5  ;;  %v28_v7 = vld [vmem:[#allocation2 + $0x7] sm:$0x1]  ;;  %v21_v8 = vld [vmem:[#allocation2] sm:$0x1] }
  0x16   :  { %vm31_vm0 = vcmp.le.s32.totalorder %v30_v6, 126  ;;  %v27_v9 = vld [vmem:[#allocation2 + $0x6] sm:$0x1]  ;;  %vm32_vm1 = vcmp.ge.s32.totalorder %v30_v6, 1  ;;  %s102_s20 = sshll.u32 %s174_s19, 4  ;;  %s103_s20 = int_to_ptr.vmem [resolvable:$true] %s102_s20 }
  0x17   :  { %v34_v11 = vsel %vm31_vm0, %v28_v7, 0.0  ;;  %v33_v14 = vsel %vm31_vm0, %v27_v9, 0.0  ;;  %s145_s21 = scalar_lea.vmem %s103_s20, 128  ;;  %p150_p9 = scmp.lt.s32.totalorder %s103_s20, %s103_s20 }
  0x18   :  { %44 = vrot.lane.b32.xlu0 %v25_v4, %s172_s18  ;;  %p146_p8 = scmp.ne.s32.totalorder %s103_s20, %s145_s21  ;;  %p151_p10 = scmp.lt.s32.totalorder %s145_s21, %s145_s21 }
  0x1a   :  { %p152_p11 = por %p151_p10, %p150_p9 }
  0x1c   :  { %p153_p12 = pnand %p152_p11, %p146_p8 }
  0x1d   :  { %v116_v10 = vpop.eup %115 }
  0x1e   :  { %v38_v12 = vadd.f32 %v116_v10, %v198_v3  ;;  %v37_v13 = vmul.f32 %v116_v10, %v21_v8 }
  0x20   :  { %v58_v15 = vadd.f32 %v38_v12, %v34_v11  ;;  %v39_v16 = vadd.f32 %v37_v13, %v201_v5 }
  0x22   :  { %59 = vrot.lane.b32.xlu1 %v58_v15, %s173_s0  ;;  %v61_v17 = vadd.f32 %v39_v16, %v33_v14 }
  0x24   :  { %62 = vrot.lane.b32.xlu0 %v61_v17, %s173_s0 }
  0x86   :  { %v41_v18 = vpop.permute.xlu0 %40 }
  0x87   :  { %v42_v19 = vsel %vm32_vm1, %v41_v18, 0.0 }
  0x88   :  { %v43_v20 = vadd.f32 %v42_v19, %v38_v12 }
  0x8a   :  { %v48_v21 = vsel %vm31_vm0, %v43_v20, 1.0  ;;  %v45_v22 = vpop.permute.xlu0 %44 }
  0x8b   :  { %117 = vrcp.f32 %v48_v21  ;;  %v46_v27 = vsel %vm32_vm1, %v45_v22, 0.0 }
  0x8c   :  { %v47_v30 = vadd.f32 %v46_v27, %v39_v16 }
  0x94   :  { %v60_v24 = vpop.permute.xlu1 %59 }
  0x95   :  { %v118_v23 = vpop.eup %117  ;;  %v65_v26 = vsel %vm31_vm0, %v60_v24, 1.0 }
  0x96   :  { %v50_v25 = vmul.f32 %v118_v23, %v48_v21  ;;  %119 = vrcp.f32 %v65_v26  ;;  %v63_v39 = vpop.permute.xlu0 %62 }
  0x97   :  { %v64_v41 = vsel %vm31_vm0, %v63_v39, 0.0 }
  0x98   :  { %v51_v28 = vsub.f32 2.0, %v50_v25 }
  0x9a   :  { %v52_v29 = vmul.f32 %v118_v23, %v51_v28 }
  0x9c   :  { %v53_v31 = vmul.f32 1.372549, %v52_v29  ;;  %v56_v32 = vmul.f32 -1.8838909, %v52_v29 }
  0x9e   :  { %v54_v33 = vmul.f32 %v53_v31, %v47_v30  ;;  %v57_v34 = vsel %vm31_vm0, %v56_v32, 0.0 }
  0x9f   :  { %75 = vrot.lane.b32.xlu1 %v57_v34, %s172_s18  ;;  %93 = vst [vmem:[#allocation5 + $0x5] sm:$0x1] %v57_v34 }
  0xa0   :  { %v55_v35 = vsel %vm31_vm0, %v54_v33, 0.0  ;;  %v120_v36 = vpop.eup %119 }
  0xa1   :  { %92 = vst [vmem:[#allocation5 + $0x4] sm:$0x1] %v55_v35  ;;  %v67_v37 = vmul.f32 %v120_v36, %v65_v26 }
  0xa3   :  { %80 = vrot.lane.b32.xlu1 %v55_v35, %s172_s18  ;;  %v68_v38 = vsub.f32 2.0, %v67_v37 }
  0xa5   :  { %v69_v40 = vmul.f32 %v120_v36, %v68_v38 }
  0xa7   :  { %v73_v42 = vmul.f32 -1.8838909, %v69_v40  ;;  %v70_v43 = vmul.f32 1.372549, %v69_v40 }
  0xa9   :  { %v71_v44 = vmul.f32 %v70_v43, %v64_v41  ;;  %v74_v45 = vsel %vm31_vm0, %v73_v42, 0.0 }
  0xaa   :  { %95 = vst [vmem:[#allocation5 + $0x7] sm:$0x1] %v74_v45 }
  0xab   :  { %v72_v46 = vsel %vm31_vm0, %v71_v44, 0.0 }
  0xac   :  { %94 = vst [vmem:[#allocation5 + $0x6] sm:$0x1] %v72_v46 }
 0x111   :  { %v76_v47 = vpop.permute.xlu1 %75 }
 0x112   :  { %v77_v48 = vsel %vm32_vm1, %v76_v47, 0.0 }
 0x113   :  { %v78_v49 = vadd.f32 %v77_v48, %v198_v3 }
 0x115   :  { %v79_v50 = vadd.f32 %v78_v49, %v74_v45  ;;  %v81_v51 = vpop.permute.xlu1 %80 }
 0x116   :  { %v82_v52 = vsel %vm32_vm1, %v81_v51, 0.0 }
 0x117   :  { %121 = vrcp.f32 %v79_v50  ;;  %v83_v53 = vadd.f32 %v82_v52, %v201_v5 }
 0x119   :  { %v84_v54 = vadd.f32 %v83_v53, %v72_v46 }
 0x121   :  { %v122_v55 = vpop.eup %121 }
 0x122   :  { %89 = vst [vmem:[#allocation5 + $0x1] sm:$0x1] %v122_v55  ;;  %v87_v56 = vmul.f32 %v122_v55, %v84_v54 }
 0x124   :  { %88 = vst [vmem:[#allocation5] sm:$0x1] %v87_v56 }
 0x125   :  { %156 = shalt.err (!%p153_p12)
}
 0x126   :  { %s157_s24 = scalar_lea.hbm %s237_s1, 128 }
 0x127   :  { %p158_p13 = scmp.ne.s32.totalorder %s237_s1, %s157_s24  ;;  %p161_p0 = scmp.lt.u32.totalorder %s157_s24, %s237_s1 }
 0x129   :  { %p163_p1 = pnand %p161_p0, %p158_p13 }
 0x12b   :  { %166 = shalt.err (!%p163_p1)
}
 0x12c   :  { %105 = dma.vmem_to_hbm [thread:$0]  %s103_s20, 128, %s237_s1, [#allocation4]  }
 0x12d   :  { %169 = dma.done.wait [#allocation4], 128  }
 0x12e   :  { %170 = vsyncadd [#allocation4], 4294967168 }
 0x12f   :  { %109 = vsyncpa [#allocation3], 1 }
 0x130   :  { %110 = vsyncpa [#allocation4], 1 }

</bundles_post_ra>
